<compile_context>
chip_gen: v7x
topology: tpu7x:2x2x1
jax: 0.10.0
libtpu: 0.0.40
codegen_flags: <defaults>
</compile_context>

<pallas_src>
import jax
import jax.numpy as jnp
from jax import lax
from jax.experimental import pallas as pl
from jax.experimental.pallas import tpu as pltpu


def _linear_kernel(x_ref, w_ref, o_ref, acc_ref):
    # x_ref:   (tm, tk)  activation tile
    # w_ref:   (tn, tk)  weight tile, PyTorch layout (output_dim, input_dim)
    # o_ref:   (tm, tn)  output tile
    # acc_ref: (tm, tn)  f32 accumulator, resident across the K grid axis
    @pl.when(pl.program_id(2) == 0)
    def _():
        acc_ref[...] = jnp.zeros_like(acc_ref)

    # y = x @ W^T without ever materializing W^T: contract on the shared
    # last (input_dim) axis of both tiles. MXU consumes this natively.
    acc_ref[...] += lax.dot_general(
        x_ref[...],
        w_ref[...],
        dimension_numbers=(((1,), (1,)), ((), ())),
        preferred_element_type=jnp.float32,
    )

    @pl.when(pl.program_id(2) == pl.num_programs(2) - 1)
    def _():
        o_ref[...] = acc_ref[...].astype(o_ref.dtype)


def _round_up(x, m):
    return ((x + m - 1) // m) * m


def linear_forward(x, weight, *, tm=256, tn=256, tk=512):
    """y = x @ weight.T  (bias=False), matching torch.nn.Linear semantics.

    x:      [batch, input_dim]        float32
    weight: [output_dim, input_dim]   float32 (PyTorch layout, NOT transposed)
    returns [batch, output_dim]       float32
    """
    batch, input_dim = x.shape
    output_dim, k_dim = weight.shape
    assert k_dim == input_dim, "weight last dim must equal input_dim"

    # Clamp tiles to the (padded) problem size while keeping TPU tiling rules:
    # block last dim multiple of 128 (lane), second-to-last multiple of 8.
    tm = min(tm, _round_up(batch, 8))
    tn = min(tn, _round_up(output_dim, 128))
    tk = min(tk, _round_up(input_dim, 128))

    m_pad = _round_up(batch, tm)
    n_pad = _round_up(output_dim, tn)
    k_pad = _round_up(input_dim, tk)

    x_p = x
    if (m_pad, k_pad) != (batch, input_dim):
        x_p = jnp.pad(x, ((0, m_pad - batch), (0, k_pad - input_dim)))
    w_p = weight
    if (n_pad, k_pad) != (output_dim, input_dim):
        w_p = jnp.pad(weight, ((0, n_pad - output_dim), (0, k_pad - input_dim)))

    grid = (m_pad // tm, n_pad // tn, k_pad // tk)

    out_p = pl.pallas_call(
        _linear_kernel,
        out_shape=jax.ShapeDtypeStruct((m_pad, n_pad), x.dtype),
        grid_spec=pltpu.PrefetchScalarGridSpec(
            num_scalar_prefetch=0,
            grid=grid,
            in_specs=[
                pl.BlockSpec((tm, tk), lambda i, j, k: (i, k)),   # x tile
                pl.BlockSpec((tn, tk), lambda i, j, k: (j, k)),   # W tile (PyTorch layout)
            ],
            out_specs=pl.BlockSpec((tm, tn), lambda i, j, k: (i, j)),  # ignores k
            scratch_shapes=[pltpu.VMEM((tm, tn), jnp.float32)],
        ),
        compiler_params=pltpu.CompilerParams(
            dimension_semantics=("parallel", "parallel", "arbitrary"),
        ),
        cost_estimate=pl.CostEstimate(
            flops=2 * m_pad * n_pad * k_pad,
            bytes_accessed=4 * (m_pad * k_pad + n_pad * k_pad + m_pad * n_pad),
            transcendentals=0,
        ),
    )(x_p, w_p)

    if (m_pad, n_pad) != (batch, output_dim):
        out_p = out_p[:batch, :output_dim]
    return out_p


if __name__ == "__main__":
    # Small shapes consistent with LinearModel(input_dim=32, output_dim=16)
    batch, input_dim, output_dim = 8, 32, 16

    key = jax.random.PRNGKey(0)
    k_x, k_w = jax.random.split(key)

    x = jax.random.normal(k_x, (batch, input_dim), dtype=jnp.float32)
    # Deterministic init mimicking nn.Linear default (uniform in +/- 1/sqrt(fan_in))
    bound = 1.0 / (input_dim ** 0.5)
    weight = jax.random.uniform(
        k_w, (output_dim, input_dim), dtype=jnp.float32, minval=-bound, maxval=bound
    )

    y = jax.jit(linear_forward)(x, weight)
    y = jax.block_until_ready(y)

    # Sanity check against plain JAX reference.
    y_ref = x @ weight.T
    assert y.shape == (batch, output_dim)
    assert jnp.allclose(y, y_ref, atol=1e-5, rtol=1e-5)

    print("KERNEL_OK")
</pallas_src>

<mosaic_0001>
module attributes {stable_mosaic.version = 11 : i64} {
  func.func @_linear_kernel(%arg0: i32, %arg1: i32, %arg2: i32, %arg3: memref<8x128xf32, #tpu.memory_space<vmem>>, %arg4: memref<128x128xf32, #tpu.memory_space<vmem>>, %arg5: memref<8x128xf32, #tpu.memory_space<vmem>>, %arg6: memref<8x128xf32, #tpu.memory_space<vmem>>) attributes {dimension_semantics = [#tpu.dimension_semantics<parallel>, #tpu.dimension_semantics<parallel>, #tpu.dimension_semantics<arbitrary>], iteration_bounds = array<i64: 1, 1, 1>, scalar_prefetch = 0 : i64, scratch_operands = 1 : i64, tpu.core_type = #tpu.core_type<tc>, window_params = [{transform_indices = @transform_0, window_bounds = array<i64: 8, 128>}, {transform_indices = @transform_1, window_bounds = array<i64: 128, 128>}, {transform_indices = @transform_2, window_bounds = array<i64: 8, 128>}]} {
    %c0_i32 = arith.constant 0 : i32
    %0 = arith.cmpi eq, %arg2, %c0_i32 : i32
    %1 = arith.extui %0 : i1 to i32
    %c0_i32_0 = arith.constant 0 : i32
    %2 = arith.cmpi ne, %1, %c0_i32_0 : i32
    scf.if %2 {
      %cst_10 = arith.constant 0.000000e+00 : f32
      %12 = vector.broadcast %cst_10 : f32 to vector<8x128xf32>
      %c0_11 = arith.constant 0 : index
      %c0_12 = arith.constant 0 : index
      %13 = vector.load %arg6[%c0_11, %c0_12] : memref<8x128xf32, #tpu.memory_space<vmem>>, vector<8x128xf32>
      tpu.vector_store %arg6[%c0_11, %c0_12], %12 {strides = array<i32>} : memref<8x128xf32, #tpu.memory_space<vmem>>, vector<8x128xf32>,
    } else {
    }
    %c0 = arith.constant 0 : index
    %c0_1 = arith.constant 0 : index
    %3 = vector.load %arg6[%c0, %c0_1] : memref<8x128xf32, #tpu.memory_space<vmem>>, vector<8x128xf32>
    %c0_2 = arith.constant 0 : index
    %c0_3 = arith.constant 0 : index
    %4 = vector.load %arg3[%c0_2, %c0_3] : memref<8x128xf32, #tpu.memory_space<vmem>>, vector<8x128xf32>
    %c0_4 = arith.constant 0 : index
    %c0_5 = arith.constant 0 : index
    %5 = vector.load %arg4[%c0_4, %c0_5] : memref<128x128xf32, #tpu.memory_space<vmem>>, vector<128x128xf32>
    %cst = arith.constant dense<0.000000e+00> : vector<8x128xf32>
    %6 = tpu.matmul %4, %5, %cst {dimension_numbers = #tpu.dot_dimension_numbers<[1], [1], [0], [0], [0, 0, 1, 0], [], []>} : vector<8x128xf32>, vector<128x128xf32>, vector<8x128xf32> -> vector<8x128xf32>
    %7 = arith.addf %3, %6 : vector<8x128xf32>
    %c0_6 = arith.constant 0 : index
    %c0_7 = arith.constant 0 : index
    %8 = vector.load %arg6[%c0_6, %c0_7] : memref<8x128xf32, #tpu.memory_space<vmem>>, vector<8x128xf32>
    tpu.vector_store %arg6[%c0_6, %c0_7], %7 {strides = array<i32>} : memref<8x128xf32, #tpu.memory_space<vmem>>, vector<8x128xf32>,
    %c0_i32_8 = arith.constant 0 : i32
    %9 = arith.cmpi eq, %arg2, %c0_i32_8 : i32
    %10 = arith.extui %9 : i1 to i32
    %c0_i32_9 = arith.constant 0 : i32
    %11 = arith.cmpi ne, %10, %c0_i32_9 : i32
    scf.if %11 {
      %c0_10 = arith.constant 0 : index
      %c0_11 = arith.constant 0 : index
      %12 = vector.load %arg6[%c0_10, %c0_11] : memref<8x128xf32, #tpu.memory_space<vmem>>, vector<8x128xf32>
      %c0_12 = arith.constant 0 : index
      %c0_13 = arith.constant 0 : index
      %13 = vector.load %arg5[%c0_12, %c0_13] : memref<8x128xf32, #tpu.memory_space<vmem>>, vector<8x128xf32>
      tpu.vector_store %arg5[%c0_12, %c0_13], %12 {strides = array<i32>} : memref<8x128xf32, #tpu.memory_space<vmem>>, vector<8x128xf32>,
    } else {
    }
    return
  }
  func.func @transform_0(%arg0: i32, %arg1: i32, %arg2: i32) -> (i32, i32) {
    %c0_i32 = arith.constant 0 : i32
    return %arg0, %arg2 : i32, i32
  }
  func.func @transform_1(%arg0: i32, %arg1: i32, %arg2: i32) -> (i32, i32) {
    %c0_i32 = arith.constant 0 : i32
    return %arg1, %arg2 : i32, i32
  }
  func.func @transform_2(%arg0: i32, %arg1: i32, %arg2: i32) -> (i32, i32) {
    %c0_i32 = arith.constant 0 : i32
    return %arg0, %arg1 : i32, i32
  }
}

</mosaic_0001>

<bundles_post_ra>
// kernel: linear_forward.1
= control target key start
LH: loop header
LB: loop body
LE: loop exit
PB: predicated region body
PF: predicated region fallthrough
CT: control target
= control target key end

     0   :  { %v230_v2 = vmov 0.0|0.0   ;;  %vm231_vm0 = vmmov 0   ;;  %v232_v4 = vmov 0.0   ;;  %s312_s0 = inlined_call_operand.vmem [shape: f32[8,128], index: 0, kind: input, shape index: {}]   ;;  %s313_s1 = inlined_call_operand.vmem [shape: f32[128,128], index: 1, kind: input, shape index: {}]   ;;  %s314_s2 = inlined_call_operand.hbm [shape: f32[8,128], index: 2, kind: output, shape index: {}]  }
   0x1   :  { %v19_v0 = vld [vmem:[%s313_s1] sm:$0xff]  ;;  %v20_v1 = vld [vmem:[%s313_s1 + $0x8] sm:$0xff]  ;;  %178 = vmatprep.subr.bf16.mxu0 %v230_v2  ;;  %175 = vmatprep.mubr.msk.f32.mxu0 %vm231_vm0, %v232_v4  ;;  %v21_v5 = vld [vmem:[%s313_s1 + $0x10] sm:$0xff] }
   0x2   :  { %v179_v3 = vpack.c.bf16 %v20_v1, %v19_v0  ;;  %v22_v6 = vld [vmem:[%s313_s1 + $0x18] sm:$0xff] }
   0x4   :  { %180 = vmatpush3.bf16.xpose.msra.mxu0 %v179_v3 }
   0x5   :  { %181 = vmatprep.subr.bf16.mxu0 %v230_v2 }
   0x6   :  { %7 = vsyncpa [#allocation4], 0  ;;  %v182_v7 = vpack.c.bf16 %v22_v6, %v21_v5  ;;  %v23_v8 = vld [vmem:[%s313_s1 + $0x20] sm:$0xff]  ;;  %v24_v9 = vld [vmem:[%s313_s1 + $0x28] sm:$0xff]  ;;  %s233_s15 = smov [#allocation3]  }
   0x7   :  { %v185_v10 = vpack.c.bf16 %v24_v9, %v23_v8  ;;  %v25_v11 = vld [vmem:[%s313_s1 + $0x30] sm:$0xff]  ;;  %v26_v12 = vld [vmem:[%s313_s1 + $0x38] sm:$0xff]  ;;  %v27_v14 = vld [vmem:[%s313_s1 + $0x40] sm:$0xff]  ;;  %s118_s16 = sshll.u32 %s233_s15, 4  ;;  %s119_s16 = int_to_ptr.vmem [resolvable:$true] %s118_s16 }
   0x8   :  { %v188_v13 = vpack.c.bf16 %v26_v12, %v25_v11  ;;  %v28_v15 = vld [vmem:[%s313_s1 + $0x48] sm:$0xff]  ;;  %v29_v17 = vld [vmem:[%s313_s1 + $0x50] sm:$0xff]  ;;  %v30_v18 = vld [vmem:[%s313_s1 + $0x58] sm:$0xff]  ;;  %s206_s17 = scalar_lea.vmem %s119_s16, 128  ;;  %p211_p1 = scmp.lt.s32.totalorder %s119_s16, %s119_s16 }
   0x9   :  { %v191_v16 = vpack.c.bf16 %v28_v15, %v27_v14  ;;  %v194_v19 = vpack.c.bf16 %v30_v18, %v29_v17  ;;  %v31_v20 = vld [vmem:[%s313_s1 + $0x60] sm:$0xff]  ;;  %v32_v21 = vld [vmem:[%s313_s1 + $0x68] sm:$0xff]  ;;  %v33_v23 = vld [vmem:[%s313_s1 + $0x70] sm:$0xff]  ;;  %p207_p0 = scmp.ne.s32.totalorder %s119_s16, %s206_s17  ;;  %p212_p2 = scmp.lt.s32.totalorder %s206_s17, %s206_s17 }
   0xa   :  { %v197_v22 = vpack.c.bf16 %v32_v21, %v31_v20  ;;  %v34_v24 = vld [vmem:[%s313_s1 + $0x78] sm:$0xff]  ;;  %v18_v26 = vld [vmem:[%s312_s0] sm:$0xff] }
   0xb   :  { %v200_v25 = vpack.c.bf16 %v34_v24, %v33_v23  ;;  %p213_p3 = por %p212_p2, %p211_p1 }
   0xc   :  { %183 = vmatpush3.bf16.xpose.msra.mxu0 %v182_v7 }
   0xd   :  { %184 = vmatprep.subr.bf16.mxu0 %v230_v2  ;;  %p214_p4 = pnand %p213_p3, %p207_p0 }
  0x14   :  { %186 = vmatpush3.bf16.xpose.msra.mxu0 %v185_v10 }
  0x15   :  { %187 = vmatprep.subr.bf16.mxu0 %v230_v2 }
  0x1c   :  { %189 = vmatpush3.bf16.xpose.msra.mxu0 %v188_v13 }
  0x1d   :  { %190 = vmatprep.subr.bf16.mxu0 %v230_v2 }
  0x24   :  { %192 = vmatpush3.bf16.xpose.msra.mxu0 %v191_v16 }
  0x25   :  { %193 = vmatprep.subr.bf16.mxu0 %v230_v2 }
  0x2c   :  { %195 = vmatpush3.bf16.xpose.msra.mxu0 %v194_v19 }
  0x2d   :  { %196 = vmatprep.subr.bf16.mxu0 %v230_v2 }
  0x34   :  { %198 = vmatpush3.bf16.xpose.msra.mxu0 %v197_v22 }
  0x35   :  { %199 = vmatprep.subr.bf16.mxu0 %v230_v2 }
  0x3c   :  { %201 = vmatpush3.bf16.xpose.msra.mxu0 %v200_v25 }
  0x43   :  { %176 = vmatmul.mubr.f32.vlgmr.msra.gmra.mrb[0].mxu0 %v18_v26 }
 0x116   :  { %v101_v27 = vpop.f32.mrb[0].mxu0 }
 0x117   :  { %111 = vst [vmem:[#allocation3] sm:$0xff] %v101_v27  ;;  %v177_v28 = vpop.f32.mrb[1].mxu0 }
 0x118   :  { %217 = shalt.err (!%p214_p4)
}
 0x119   :  { %s218_s19 = scalar_lea.hbm %s314_s2, 128 }
 0x11a   :  { %p219_p5 = scmp.ne.s32.totalorder %s314_s2, %s218_s19  ;;  %p222_p6 = scmp.lt.u32.totalorder %s218_s19, %s314_s2 }
 0x11c   :  { %p224_p7 = pnand %p222_p6, %p219_p5 }
 0x11e   :  { %227 = shalt.err (!%p224_p7)
}
 0x11f   :  { %121 = dma.vmem_to_hbm [thread:$0]  %s119_s16, 128, %s314_s2, [#allocation4]  }
 0x120   :  { %228 = dma.done.wait [#allocation4], 128  }
 0x121   :  { %229 = vsyncadd [#allocation4], 4294967168 }
 0x122   :  { %125 = vsyncpa [#allocation4], 1 }

</bundles_post_ra>
